<compile_context>
chip_gen: v7x
topology: tpu7x:2x2x1
jax: 0.10.0
libtpu: 0.0.40
codegen_flags: <defaults>
</compile_context>

<pallas_src>
import functools

import jax
import jax.numpy as jnp
from jax import lax
from jax.experimental import pallas as pl
from jax.experimental.pallas import tpu as pltpu

EPS = 1e-5


def _ds_kernel(x_ref, dwt_ref, dws_ref, pwB_ref, pws_ref, out_ref,
               *, Nb, H, W, Cin, Cout, mxu_dtype, pack_rows):
    # x_ref  : (Nb, H+6, (W+6)*Cin)  reflect-padded input, lane-dense W⊗C layout
    # dwt_ref: (9, W*Cin)            BN1-scaled depthwise weights, tiled over W
    # dws_ref: (1, W*Cin)            depthwise bias + BN1 shift, tiled over W
    # pwB_ref: (W*Cin, W*Cout)       block-diag pointwise matrix (bf16/f32),
    #                                BN2 scale folded, cols ordered [even|odd]
    # pws_ref: (1, W*Cout)           pointwise bias + BN2 shift, tiled (f32)
    # out_ref: (Nb, Ho//2, 2*Wo*Cout) if pack_rows else (Nb, Ho, Wo*Cout)
    Ho, Wo = H // 2, W // 2
    WCi = W * Cin
    half = Wo * Cout

    xp = x_ref[...]                                  # (Nb, H+6, (W+6)*Cin)
    dwt = dwt_ref[...]                               # (9, W*Cin)

    # --- depthwise 3x3 conv, dilation=3 (padding pre-applied), BN1 folded -----
    # Accumulator initialized with tap 0 (no zero materialization).
    acc = xp[:, 0:H, 0:WCi] * dwt[0:1, :]
    for t in range(1, 9):
        ki, kj = divmod(t, 3)
        tap = xp[:, ki * 3:ki * 3 + H, kj * 3 * Cin:kj * 3 * Cin + WCi]
        acc = acc + tap * dwt[t:t + 1, :]
    x1 = jnp.clip(acc + dws_ref[...], 0.0, 6.0)      # ReLU6, (Nb, H, W*Cin)

    # --- pointwise 1x1 conv + BN2 scale: ONE MXU matmul over all Nb*H rows ----
    x1m = x1.reshape(Nb * H, WCi).astype(mxu_dtype)  # leading-dim merge only
    y = lax.dot_general(x1m, pwB_ref[...], (((1,), (0,)), ((), ())),
                        preferred_element_type=jnp.float32)   # (Nb*H, W*Cout)
    y = jnp.clip(y + pws_ref[...], 0.0, 6.0)         # ReLU6

    # --- MaxPool2d(2): W-pool = max of the two lane halves (even/odd columns);
    #     H-pool = max over adjacent row pairs (leading-dim reshapes only). ----
    wpool = jnp.maximum(y[:, :half], y[:, half:])                # (Nb*H, half)
    pooled = wpool.reshape(Nb * Ho, 2, half).max(axis=1)         # (Nb*Ho, half)
    if pack_rows:
        # Pack two pooled rows per output row -> lane width 2*half (>=128 here),
        # using only a 64|64 lane concat (no sublane->lane reshape).
        pe = pooled.reshape(Nb * (Ho // 2), 2, half)
        packed = jnp.concatenate([pe[:, 0, :], pe[:, 1, :]], axis=-1)
        out_ref[...] = packed.reshape(Nb, Ho // 2, 2 * half)
    else:
        out_ref[...] = pooled.reshape(Nb, Ho, half)


def _pick_batch_block(N, H):
    """Fold batches so the pointwise matmul's M dim approaches 128 rows while
    keeping >= 2 grid steps when N >= 2 (v7x megacore sharding)."""
    target = max(1, 128 // max(H, 1))
    cap = max(1, N // 2) if N >= 2 else 1
    best = 1
    for d in range(1, min(target, cap) + 1):
        if N % d == 0:
            best = d
    return best


def depth_separable_conv_dilation_nhwc(x_nhwc, params, *,
                                       mxu_dtype=jnp.bfloat16,
                                       batch_block=None):
    """Core entry point: NHWC in, NHWC out (no layout round-trips)."""
    N, H, W, Cin = x_nhwc.shape
    Cout = params["pw_weight"].shape[0]
    assert H % 2 == 0 and W % 2 == 0 and H >= 4 and W >= 4
    Ho, Wo = H // 2, W // 2
    Hp, Wp = H + 6, W + 6

    Nb = batch_block if batch_block is not None else _pick_batch_block(N, H)
    assert N % Nb == 0
    pack_rows = (Ho % 2 == 0)

    # Reflect pad + lane-dense slab (N, Hp, Wp*Cin).
    # TODO(synk): move this halo construction inside the kernel.
    xpad = jnp.pad(x_nhwc.astype(jnp.float32),
                   ((0, 0), (3, 3), (3, 3), (0, 0)), mode="reflect")
    xflat = xpad.reshape(N, Hp, Wp * Cin)

    # --- fold BN1 (eval) into depthwise weights / shift, tile over W ----------
    s1 = params["bn1_gamma"] / jnp.sqrt(params["bn1_var"] + EPS)
    dw_w = jnp.transpose(params["dw_weight"][:, 0], (1, 2, 0)) * s1       # (3,3,Cin)
    dw_tiled = jnp.tile(dw_w.reshape(9, Cin), (1, W))                     # (9, W*Cin)
    dw_shift = s1 * (params["dw_bias"] - params["bn1_mean"]) + params["bn1_beta"]
    dw_shift_t = jnp.tile(dw_shift, W).reshape(1, W * Cin)

    # --- fold BN2 (eval) into pointwise weights; block-diagonal matrix with ---
    # output columns reordered [even-w | odd-w] (W-pool = max of lane halves).
    s2 = params["bn2_gamma"] / jnp.sqrt(params["bn2_var"] + EPS)
    pw_eff = jnp.transpose(params["pw_weight"][:, :, 0, 0], (1, 0)) * s2[None, :]
    eye = jnp.eye(W, dtype=jnp.float32)
    B = jnp.einsum("wv,ck->wcvk", eye, pw_eff)                            # (W,Cin,W,Cout)
    perm = jnp.concatenate([jnp.arange(0, W, 2), jnp.arange(1, W, 2)])
    B = B[:, :, perm, :].reshape(W * Cin, W * Cout).astype(mxu_dtype)
    pw_shift = s2 * (params["pw_bias"] - params["bn2_mean"]) + params["bn2_beta"]
    pw_shift_t = jnp.tile(pw_shift, W).reshape(1, W * Cout)

    if pack_rows:
        out_shape = (N, Ho // 2, 2 * Wo * Cout)
        out_block = (Nb, Ho // 2, 2 * Wo * Cout)
    else:
        out_shape = (N, Ho, Wo * Cout)
        out_block = (Nb, Ho, Wo * Cout)

    kernel = functools.partial(_ds_kernel, Nb=Nb, H=H, W=W, Cin=Cin, Cout=Cout,
                               mxu_dtype=mxu_dtype, pack_rows=pack_rows)
    out_flat = pl.pallas_call(
        kernel,
        out_shape=jax.ShapeDtypeStruct(out_shape, jnp.float32),
        grid=(N // Nb,),
        in_specs=[
            pl.BlockSpec((Nb, Hp, Wp * Cin), lambda n: (n, 0, 0)),
            pl.BlockSpec((9, W * Cin), lambda n: (0, 0)),
            pl.BlockSpec((1, W * Cin), lambda n: (0, 0)),
            pl.BlockSpec((W * Cin, W * Cout), lambda n: (0, 0)),
            pl.BlockSpec((1, W * Cout), lambda n: (0, 0)),
        ],
        out_specs=pl.BlockSpec(out_block, lambda n: (n, 0, 0)),
        compiler_params=pltpu.CompilerParams(dimension_semantics=("parallel",)),
    )(xflat, dw_tiled, dw_shift_t, B, pw_shift_t)

    # Both packed and unpacked layouts flatten row-major to (N, Ho, Wo, Cout).
    return out_flat.reshape(N, Ho, Wo, Cout)


def depth_separable_conv_dilation(x_nchw, params, **kw):
    """NCHW adapter matching the PyTorch module interface."""
    x = jnp.transpose(x_nchw, (0, 2, 3, 1))
    y = depth_separable_conv_dilation_nhwc(x, params, **kw)
    return jnp.transpose(y, (0, 3, 1, 2))


def init_params(key, cin, cout):
    ks = jax.random.split(key, 12)
    nrm = lambda k, shape, s: s * jax.random.normal(k, shape, jnp.float32)
    return dict(
        dw_weight=nrm(ks[0], (cin, 1, 3, 3), 0.3),      # Conv2d groups=cin
        dw_bias=nrm(ks[1], (cin,), 0.1),
        bn1_gamma=1.0 + nrm(ks[2], (cin,), 0.1),
        bn1_beta=nrm(ks[3], (cin,), 0.1),
        bn1_mean=nrm(ks[4], (cin,), 0.1),
        bn1_var=0.9 + 0.2 * jax.random.uniform(ks[5], (cin,), jnp.float32),
        pw_weight=nrm(ks[6], (cout, cin, 1, 1), 0.3),   # Conv2d 1x1
        pw_bias=nrm(ks[7], (cout,), 0.1),
        bn2_gamma=1.0 + nrm(ks[8], (cout,), 0.1),
        bn2_beta=nrm(ks[9], (cout,), 0.1),
        bn2_mean=nrm(ks[10], (cout,), 0.1),
        bn2_var=0.9 + 0.2 * jax.random.uniform(ks[11], (cout,), jnp.float32),
    )


def _reference(x_nchw, params):
    """Pure-JAX (XLA) reference of the PyTorch forward for validation."""
    N, Cin, H, W = x_nchw.shape
    x = jnp.transpose(x_nchw, (0, 2, 3, 1))
    xpad = jnp.pad(x, ((0, 0), (3, 3), (3, 3), (0, 0)), mode="reflect")
    dw_k = jnp.transpose(params["dw_weight"], (2, 3, 1, 0))             # HWIO
    z = lax.conv_general_dilated(xpad, dw_k, (1, 1), "VALID",
                                 rhs_dilation=(3, 3),
                                 dimension_numbers=("NHWC", "HWIO", "NHWC"),
                                 feature_group_count=Cin)
    z = z + params["dw_bias"]
    z = ((z - params["bn1_mean"]) / jnp.sqrt(params["bn1_var"] + EPS)
         * params["bn1_gamma"] + params["bn1_beta"])
    z = jnp.clip(z, 0.0, 6.0)
    y = jnp.einsum("nhwc,co->nhwo", z,
                   jnp.transpose(params["pw_weight"][:, :, 0, 0], (1, 0)))
    y = y + params["pw_bias"]
    y = ((y - params["bn2_mean"]) / jnp.sqrt(params["bn2_var"] + EPS)
         * params["bn2_gamma"] + params["bn2_beta"])
    y = jnp.clip(y, 0.0, 6.0)
    y = lax.reduce_window(y, -jnp.inf, lax.max,
                          (1, 2, 2, 1), (1, 2, 2, 1), "VALID")
    return jnp.transpose(y, (0, 3, 1, 2))


if __name__ == "__main__":
    key = jax.random.PRNGKey(0)
    kx, kp = jax.random.split(key)
    Cin, Cout = 4, 8
    x = jax.random.normal(kx, (2, Cin, 16, 16), jnp.float32)
    params = init_params(kp, Cin, Cout)

    ref = _reference(x, params)

    # Strict f32-MXU path check (same tolerance as the original kernel).
    out_f32 = jax.block_until_ready(
        depth_separable_conv_dilation(x, params, mxu_dtype=jnp.float32))
    assert out_f32.shape == (2, Cout, 8, 8), out_f32.shape
    err_f32 = float(jnp.max(jnp.abs(out_f32 - ref)))
    assert jnp.allclose(out_f32, ref, rtol=1e-4, atol=1e-4), err_f32

    # Default bf16-MXU path (per perf review); block-diagonal B keeps the
    # effective reduction depth at Cin=4, so the tolerance stays tight-ish.
    out = jax.block_until_ready(depth_separable_conv_dilation(x, params))
    assert out.shape == (2, Cout, 8, 8), out.shape
    err_bf16 = float(jnp.max(jnp.abs(out - ref)))
    assert jnp.allclose(out, ref, rtol=5e-2, atol=5e-2), err_bf16

    print("KERNEL_OK")
</pallas_src>

<mosaic_0001>
module attributes {stable_mosaic.version = 11 : i64} {
  func.func @_ds_kernel(%arg0: i32, %arg1: memref<1x22x88xf32, #tpu.memory_space<vmem>>, %arg2: memref<9x64xf32, #tpu.memory_space<vmem>>, %arg3: memref<1x64xf32, #tpu.memory_space<vmem>>, %arg4: memref<64x128xf32, #tpu.memory_space<vmem>>, %arg5: memref<1x128xf32, #tpu.memory_space<vmem>>, %arg6: memref<1x4x128xf32, #tpu.memory_space<vmem>>) attributes {dimension_semantics = [#tpu.dimension_semantics<parallel>], iteration_bounds = array<i64: 2>, scalar_prefetch = 0 : i64, scratch_operands = 0 : i64, tpu.core_type = #tpu.core_type<tc>, window_params = [{transform_indices = @transform_0, window_bounds = array<i64: 1, 22, 88>}, {pipeline_mode = #tpu.pipeline_mode<synchronous>, transform_indices = @transform_1, window_bounds = array<i64: 9, 64>}, {pipeline_mode = #tpu.pipeline_mode<synchronous>, transform_indices = @transform_2, window_bounds = array<i64: 1, 64>}, {pipeline_mode = #tpu.pipeline_mode<synchronous>, transform_indices = @transform_3, window_bounds = array<i64: 64, 128>}, {pipeline_mode = #tpu.pipeline_mode<synchronous>, transform_indices = @transform_4, window_bounds = array<i64: 1, 128>}, {transform_indices = @transform_5, window_bounds = array<i64: 1, 4, 128>}]} {
    %c0 = arith.constant 0 : index
    %c0_0 = arith.constant 0 : index
    %c0_1 = arith.constant 0 : index
    %0 = vector.load %arg1[%c0, %c0_0, %c0_1] : memref<1x22x88xf32, #tpu.memory_space<vmem>>, vector<1x22x88xf32>
    %c0_2 = arith.constant 0 : index
    %c0_3 = arith.constant 0 : index
    %1 = vector.load %arg2[%c0_2, %c0_3] : memref<9x64xf32, #tpu.memory_space<vmem>>, vector<9x64xf32>
    %2 = vector.extract_strided_slice %0 {offsets = [0, 0, 0], sizes = [1, 16, 64], strides = [1, 1, 1]} : vector<1x22x88xf32> to vector<1x16x64xf32>
    %3 = vector.extract_strided_slice %1 {offsets = [0, 0], sizes = [1, 64], strides = [1, 1]} : vector<9x64xf32> to vector<1x64xf32>
    %4 = vector.shape_cast %3 : vector<1x64xf32> to vector<1x1x64xf32>
    %5 = vector.broadcast %4 : vector<1x1x64xf32> to vector<1x16x64xf32>
    %6 = arith.mulf %2, %5 : vector<1x16x64xf32>
    %7 = vector.extract_strided_slice %0 {offsets = [0, 0, 12], sizes = [1, 16, 64], strides = [1, 1, 1]} : vector<1x22x88xf32> to vector<1x16x64xf32>
    %8 = vector.extract_strided_slice %1 {offsets = [1, 0], sizes = [1, 64], strides = [1, 1]} : vector<9x64xf32> to vector<1x64xf32>
    %9 = vector.shape_cast %8 : vector<1x64xf32> to vector<1x1x64xf32>
    %10 = vector.broadcast %9 : vector<1x1x64xf32> to vector<1x16x64xf32>
    %11 = arith.mulf %7, %10 : vector<1x16x64xf32>
    %12 = arith.addf %6, %11 : vector<1x16x64xf32>
    %13 = vector.extract_strided_slice %0 {offsets = [0, 0, 24], sizes = [1, 16, 64], strides = [1, 1, 1]} : vector<1x22x88xf32> to vector<1x16x64xf32>
    %14 = vector.extract_strided_slice %1 {offsets = [2, 0], sizes = [1, 64], strides = [1, 1]} : vector<9x64xf32> to vector<1x64xf32>
    %15 = vector.shape_cast %14 : vector<1x64xf32> to vector<1x1x64xf32>
    %16 = vector.broadcast %15 : vector<1x1x64xf32> to vector<1x16x64xf32>
    %17 = arith.mulf %13, %16 : vector<1x16x64xf32>
    %18 = arith.addf %12, %17 : vector<1x16x64xf32>
    %19 = vector.extract_strided_slice %0 {offsets = [0, 3, 0], sizes = [1, 16, 64], strides = [1, 1, 1]} : vector<1x22x88xf32> to vector<1x16x64xf32>
    %20 = vector.extract_strided_slice %1 {offsets = [3, 0], sizes = [1, 64], strides = [1, 1]} : vector<9x64xf32> to vector<1x64xf32>
    %21 = vector.shape_cast %20 : vector<1x64xf32> to vector<1x1x64xf32>
    %22 = vector.broadcast %21 : vector<1x1x64xf32> to vector<1x16x64xf32>
    %23 = arith.mulf %19, %22 : vector<1x16x64xf32>
    %24 = arith.addf %18, %23 : vector<1x16x64xf32>
    %25 = vector.extract_strided_slice %0 {offsets = [0, 3, 12], sizes = [1, 16, 64], strides = [1, 1, 1]} : vector<1x22x88xf32> to vector<1x16x64xf32>
    %26 = vector.extract_strided_slice %1 {offsets = [4, 0], sizes = [1, 64], strides = [1, 1]} : vector<9x64xf32> to vector<1x64xf32>
    %27 = vector.shape_cast %26 : vector<1x64xf32> to vector<1x1x64xf32>
    %28 = vector.broadcast %27 : vector<1x1x64xf32> to vector<1x16x64xf32>
    %29 = arith.mulf %25, %28 : vector<1x16x64xf32>
    %30 = arith.addf %24, %29 : vector<1x16x64xf32>
    %31 = vector.extract_strided_slice %0 {offsets = [0, 3, 24], sizes = [1, 16, 64], strides = [1, 1, 1]} : vector<1x22x88xf32> to vector<1x16x64xf32>
    %32 = vector.extract_strided_slice %1 {offsets = [5, 0], sizes = [1, 64], strides = [1, 1]} : vector<9x64xf32> to vector<1x64xf32>
    %33 = vector.shape_cast %32 : vector<1x64xf32> to vector<1x1x64xf32>
    %34 = vector.broadcast %33 : vector<1x1x64xf32> to vector<1x16x64xf32>
    %35 = arith.mulf %31, %34 : vector<1x16x64xf32>
    %36 = arith.addf %30, %35 : vector<1x16x64xf32>
    %37 = vector.extract_strided_slice %0 {offsets = [0, 6, 0], sizes = [1, 16, 64], strides = [1, 1, 1]} : vector<1x22x88xf32> to vector<1x16x64xf32>
    %38 = vector.extract_strided_slice %1 {offsets = [6, 0], sizes = [1, 64], strides = [1, 1]} : vector<9x64xf32> to vector<1x64xf32>
    %39 = vector.shape_cast %38 : vector<1x64xf32> to vector<1x1x64xf32>
    %40 = vector.broadcast %39 : vector<1x1x64xf32> to vector<1x16x64xf32>
    %41 = arith.mulf %37, %40 : vector<1x16x64xf32>
    %42 = arith.addf %36, %41 : vector<1x16x64xf32>
    %43 = vector.extract_strided_slice %0 {offsets = [0, 6, 12], sizes = [1, 16, 64], strides = [1, 1, 1]} : vector<1x22x88xf32> to vector<1x16x64xf32>
    %44 = vector.extract_strided_slice %1 {offsets = [7, 0], sizes = [1, 64], strides = [1, 1]} : vector<9x64xf32> to vector<1x64xf32>
    %45 = vector.shape_cast %44 : vector<1x64xf32> to vector<1x1x64xf32>
    %46 = vector.broadcast %45 : vector<1x1x64xf32> to vector<1x16x64xf32>
    %47 = arith.mulf %43, %46 : vector<1x16x64xf32>
    %48 = arith.addf %42, %47 : vector<1x16x64xf32>
    %49 = vector.extract_strided_slice %0 {offsets = [0, 6, 24], sizes = [1, 16, 64], strides = [1, 1, 1]} : vector<1x22x88xf32> to vector<1x16x64xf32>
    %50 = vector.extract_strided_slice %1 {offsets = [8, 0], sizes = [1, 64], strides = [1, 1]} : vector<9x64xf32> to vector<1x64xf32>
    %51 = vector.shape_cast %50 : vector<1x64xf32> to vector<1x1x64xf32>
    %52 = vector.broadcast %51 : vector<1x1x64xf32> to vector<1x16x64xf32>
    %53 = arith.mulf %49, %52 : vector<1x16x64xf32>
    %54 = arith.addf %48, %53 : vector<1x16x64xf32>
    %c0_4 = arith.constant 0 : index
    %c0_5 = arith.constant 0 : index
    %55 = vector.load %arg3[%c0_4, %c0_5] : memref<1x64xf32, #tpu.memory_space<vmem>>, vector<1x64xf32>
    %56 = vector.shape_cast %55 : vector<1x64xf32> to vector<1x1x64xf32>
    %57 = vector.broadcast %56 : vector<1x1x64xf32> to vector<1x16x64xf32>
    %58 = arith.addf %54, %57 : vector<1x16x64xf32>
    %cst = arith.constant 0.000000e+00 : f32
    %cst_6 = arith.constant 6.000000e+00 : f32
    %59 = vector.broadcast %cst : f32 to vector<1x16x64xf32>
    %60 = arith.maximumf %59, %58 : vector<1x16x64xf32>
    %61 = vector.broadcast %cst_6 : f32 to vector<1x16x64xf32>
    %62 = arith.minimumf %61, %60 : vector<1x16x64xf32>
    %63 = vector.shape_cast %62 : vector<1x16x64xf32> to vector<16x64xf32>
    %c0_7 = arith.constant 0 : index
    %c0_8 = arith.constant 0 : index
    %64 = vector.load %arg4[%c0_7, %c0_8] : memref<64x128xf32, #tpu.memory_space<vmem>>, vector<64x128xf32>
    %cst_9 = arith.constant dense<0.000000e+00> : vector<16x128xf32>
    %65 = tpu.matmul %63, %64, %cst_9 {dimension_numbers = #tpu.dot_dimension_numbers<[1], [0], [0], [1], [0, 0, 1, 1], [], []>} : vector<16x64xf32>, vector<64x128xf32>, vector<16x128xf32> -> vector<16x128xf32>
    %c0_10 = arith.constant 0 : index
    %c0_11 = arith.constant 0 : index
    %66 = vector.load %arg5[%c0_10, %c0_11] : memref<1x128xf32, #tpu.memory_space<vmem>>, vector<1x128xf32>
    %67 = vector.broadcast %66 : vector<1x128xf32> to vector<16x128xf32>
    %68 = arith.addf %65, %67 : vector<16x128xf32>
    %cst_12 = arith.constant 0.000000e+00 : f32
    %cst_13 = arith.constant 6.000000e+00 : f32
    %69 = vector.broadcast %cst_12 : f32 to vector<16x128xf32>
    %70 = arith.maximumf %69, %68 : vector<16x128xf32>
    %71 = vector.broadcast %cst_13 : f32 to vector<16x128xf32>
    %72 = arith.minimumf %71, %70 : vector<16x128xf32>
    %73 = vector.extract_strided_slice %72 {offsets = [0, 0], sizes = [16, 64], strides = [1, 1]} : vector<16x128xf32> to vector<16x64xf32>
    %74 = vector.extract_strided_slice %72 {offsets = [0, 64], sizes = [16, 64], strides = [1, 1]} : vector<16x128xf32> to vector<16x64xf32>
    %75 = arith.maximumf %73, %74 : vector<16x64xf32>
    %76 = vector.shape_cast %75 : vector<16x64xf32> to vector<8x2x64xf32>
    %cst_14 = arith.constant dense<0xFF800000> : vector<8x64xf32>
    %77 = vector.multi_reduction <maximumf>, %76, %cst_14 [1] : vector<8x2x64xf32> to vector<8x64xf32>
    %78 = vector.shape_cast %77 : vector<8x64xf32> to vector<4x2x64xf32>
    %79 = vector.extract_strided_slice %78 {offsets = [0, 0, 0], sizes = [4, 1, 64], strides = [1, 1, 1]} : vector<4x2x64xf32> to vector<4x1x64xf32>
    %80 = vector.shape_cast %79 : vector<4x1x64xf32> to vector<4x64xf32>
    %81 = vector.extract_strided_slice %78 {offsets = [0, 1, 0], sizes = [4, 1, 64], strides = [1, 1, 1]} : vector<4x2x64xf32> to vector<4x1x64xf32>
    %82 = vector.shape_cast %81 : vector<4x1x64xf32> to vector<4x64xf32>
    %83 = tpu.concatenate %80, %82 in 1 : vector<4x64xf32>, vector<4x64xf32> -> vector<4x128xf32>
    %84 = vector.shape_cast %83 : vector<4x128xf32> to vector<1x4x128xf32>
    %c0_15 = arith.constant 0 : index
    %c0_16 = arith.constant 0 : index
    %c0_17 = arith.constant 0 : index
    %85 = vector.load %arg6[%c0_15, %c0_16, %c0_17] : memref<1x4x128xf32, #tpu.memory_space<vmem>>, vector<1x4x128xf32>
    tpu.vector_store %arg6[%c0_15, %c0_16, %c0_17], %84 {strides = array<i32>} : memref<1x4x128xf32, #tpu.memory_space<vmem>>, vector<1x4x128xf32>,
    return
  }
  func.func @transform_0(%arg0: i32) -> (i32, i32, i32) {
    %c0_i32 = arith.constant 0 : i32
    %c0_i32_0 = arith.constant 0 : i32
    %c0_i32_1 = arith.constant 0 : i32
    return %arg0, %c0_i32, %c0_i32_0 : i32, i32, i32
  }
  func.func @transform_1(%arg0: i32) -> (i32, i32) {
    %c0_i32 = arith.constant 0 : i32
    %c0_i32_0 = arith.constant 0 : i32
    %c0_i32_1 = arith.constant 0 : i32
    return %c0_i32, %c0_i32_0 : i32, i32
  }
  func.func @transform_2(%arg0: i32) -> (i32, i32) {
    %c0_i32 = arith.constant 0 : i32
    %c0_i32_0 = arith.constant 0 : i32
    %c0_i32_1 = arith.constant 0 : i32
    return %c0_i32, %c0_i32_0 : i32, i32
  }
  func.func @transform_3(%arg0: i32) -> (i32, i32) {
    %c0_i32 = arith.constant 0 : i32
    %c0_i32_0 = arith.constant 0 : i32
    %c0_i32_1 = arith.constant 0 : i32
    return %c0_i32, %c0_i32_0 : i32, i32
  }
  func.func @transform_4(%arg0: i32) -> (i32, i32) {
    %c0_i32 = arith.constant 0 : i32
    %c0_i32_0 = arith.constant 0 : i32
    %c0_i32_1 = arith.constant 0 : i32
    return %c0_i32, %c0_i32_0 : i32, i32
  }
  func.func @transform_5(%arg0: i32) -> (i32, i32, i32) {
    %c0_i32 = arith.constant 0 : i32
    %c0_i32_0 = arith.constant 0 : i32
    %c0_i32_1 = arith.constant 0 : i32
    return %arg0, %c0_i32, %c0_i32_0 : i32, i32, i32
  }
}

</mosaic_0001>

<bundles_post_ra>
// kernel: tpu_custom_call.1
= control target key start
LH: loop header
LB: loop body
LE: loop exit
PB: predicated region body
PF: predicated region fallthrough
CT: control target
= control target key end

     0   :  { %10 = vsyncpa [#allocation3], 0  ;;  %s1189_s0 = inlined_call_operand.vmem [shape: f32[2,22,88], index: 0, kind: input, shape index: {}]   ;;  %s1190_s1 = inlined_call_operand.vmem [shape: f32[9,64], index: 1, kind: input, shape index: {}]   ;;  %s1191_s2 = inlined_call_operand.vmem [shape: f32[1,64], index: 2, kind: input, shape index: {}]   ;;  %s1192_s3 = inlined_call_operand.vmem [shape: f32[64,128], index: 3, kind: input, shape index: {}]   ;;  %s1193_s4 = inlined_call_operand.vmem [shape: f32[1,128], index: 4, kind: input, shape index: {}]   ;;  %s1194_s5 = inlined_call_operand.hbm [shape: f32[2,4,128], index: 5, kind: output, shape index: {}]  }
   0x1   :  { %12 = vsyncpa [#allocation3 + $0x1], 0  ;;  %s950_s18 = smov 0   ;;  %s952_s19 = smov 0  }
   0x2   :  { %s954_s20 = smov 0   ;;  %s956_s21 = smov 0  }
   0x3 LB: > { %s971_s22 = sadd.s32 4294967295, %s911_s21   ;;  %s743_s23 = sadd.s32 4294967294, %s911_s21   ;;  %s911_s21 = sphi %s956_s21, %s1200_s21   ;;  %s907_s20 = sphi %s954_s20, %s1199_s20   ;;  %s903_s19 = sphi %s952_s19, %s1198_s19   ;;  %s899_s18 = sphi %s950_s18, %s1197_s18  }
   0x4   : > { %s975_s24 = sadd.s32 1, %s911_s21   ;;  %s135_s25 = sadd.s32 1, %s907_s20 }
   0x5   : > { %s132_s26 = ssub.s32 %s911_s21, %s975_s24  ;;  %p145_p0 = scmp.ne.s32.totalorder %s907_s20, %s903_s19 }
   0x6   : > { %p133_p1 = scmp.eq.s32.totalorder %s132_s26, 0  ;;  %p146_p2 = scmp.eq.s32.totalorder %s971_s22, 1 }
   0x7   : > { %p151_p3 = scmp.ne.s32.totalorder %s903_s19, %s899_s18  ;;  %p152_p4 = scmp.eq.s32.totalorder %s743_s23, 1 }
   0x8   : > { %s986_s27 = scalar_select %p133_p1, %s907_s20, %s135_s25  }
   0x9   : > { %p988_p5 = por %p146_p2, %p145_p0  ;;  %p992_p6 = por %p152_p4, %p151_p3 }
   0xa   : > { %p746_p7 = scmp.ge.s32.totalorder %s911_s21, 1  ;;  %p190_p8 = scmp.lt.s32.totalorder %s911_s21, 3 }
   0xc   : > { %p191_p9 = pnand %p746_p7, %p190_p8 }
   0xd   : > { %v228_v0 = vlaneseq (!%p191_p9)  ;;  %v1003_v2 = vld [vmem:[%s1190_s1] sm:$0xff] (!%p191_p9)  ;;  %s913_s7 = smov (!%p191_p9), 12   ;;  %s914_s8 = smov (!%p191_p9), 24   ;;  %v749_v13 = vld [vmem:[%s1190_s1 + $0x8] ss:$0 sm:$0xff] (!%p191_p9)  ;;  %vm284_vm0 = vcmask (!%p191_p9), 1044480  }
   0xe   : > { %194 = sbr.rel (%p191_p9) target bundleno = 771 (0x303), region = 40  ;;  %p218_p10 = scmp.lt.s32.totalorder (!%p191_p9), %s971_s22, 1  ;;  %v435_v34 = vld [vmem:[%s1192_s3] sm:$0xff] (!%p191_p9)  ;;  %v436_v35 = vld [vmem:[%s1192_s3 + $0x8] sm:$0xff] (!%p191_p9)  ;;  %vm358_vm1 = vcmask (!%p191_p9), 1041408   ;;  %v437_v51 = vld [vmem:[%s1192_s3 + $0x10] sm:$0xff] (!%p191_p9) }
   0xf   : > { %v998_v1 = vshrl.u32 (!%p191_p9), %v228_v0, 7  ;;  %v787_v41 = vpack.c.bf16 (!%p191_p9), %v436_v35, %v435_v34  ;;  %s915_s26 = smov (!%p191_p9), 116   ;;  %v438_v52 = vld [vmem:[%s1192_s3 + $0x18] sm:$0xff] (!%p191_p9)  ;;  %s916_s9 = smov (!%p191_p9), 104   ;;  %vm450_vm2 = vcmask (!%p191_p9), 523264   ;;  %vm590_vm3 = vcmask (!%p191_p9), 517120  }
  0x10   : > { %v791_v61 = vpack.c.bf16 (!%p191_p9), %v438_v52, %v437_v51  ;;  %s917_s6 = smov (!%p191_p9), 64   ;;  %vm651_vm4 = vcmask (!%p191_p9), 1041409   ;;  %vm653_vm5 = vcmask (!%p191_p9), 1042434   ;;  %vm655_vm6 = vcmask (!%p191_p9), 1043459  }
  0x11   : > { %v236_v3 = vsub.s32 (!%p191_p9), 1, %v998_v1  ;;  %v256_v4 = vsub.s32 (!%p191_p9), 2, %v998_v1  ;;  %v296_v5 = vsub.s32 (!%p191_p9), 4, %v998_v1  ;;  %v323_v6 = vsub.s32 (!%p191_p9), 5, %v998_v1  ;;  %788 = vmatprep.subr.bf16.mxu0 (!%p191_p9), %v787_v41 }
  0x12   : > { %v370_v11 = vsub.s32 (!%p191_p9), 7, %v998_v1  ;;  %v276_v14 = vsub.s32 (!%p191_p9), 3, %v998_v1  ;;  %v350_v27 = vsub.s32 (!%p191_p9), 6, %v998_v1  ;;  %790 = vmatpush3.bf16.msra.mxu0 (!%p191_p9), %v787_v41 }
  0x13   : > { %v237_v7 = vrot.slane (!%p191_p9), %v1003_v2, %v236_v3  ;;  %v297_v8 = vrot.slane (!%p191_p9), %v1003_v2, %v296_v5  ;;  %v257_v9 = vrot.slane (!%p191_p9), %v1003_v2, %v256_v4  ;;  %v324_v10 = vrot.slane (!%p191_p9), %v1003_v2, %v323_v6  ;;  %v439_v5 = vld [vmem:[%s1192_s3 + $0x20] sm:$0xff] (!%p191_p9)  ;;  %v440_v6 = vld [vmem:[%s1192_s3 + $0x28] sm:$0xff] (!%p191_p9)  ;;  %792 = vmatprep.subr.bf16.mxu0 (!%p191_p9), %v791_v61 }
  0x14   : > { %v371_v12 = vrot.slane (!%p191_p9), %v1003_v2, %v370_v11  ;;  %v277_v15 = vrot.slane (!%p191_p9), %v1003_v2, %v276_v14  ;;  %v351_v28 = vrot.slane (!%p191_p9), %v1003_v2, %v350_v27  ;;  %v795_v14 = vpack.c.bf16 (!%p191_p9), %v440_v6, %v439_v5 }
  0x15   : > { %239 = vrot.lane.b32.xlu0 %v237_v7, %s913_s7  ;;  %299 = vrot.lane.b32.xlu1 %v297_v8, %s913_s7  ;;  %s219_s11 = scalar_select %p218_p10, %s971_s22, 1 }
  0x16   : > { %794 = vmatpush3.bf16.msra.mxu0 %v791_v61 }
  0x17   : > { %s803_s12 = smul.u32 24, %s219_s11  ;;  %796 = vmatprep.subr.bf16.mxu0 %v795_v14 }
  0x19   : > { %259 = vrot.lane.b32.xlu0 %v257_v9, %s914_s8  ;;  %326 = vrot.lane.b32.xlu1 %v324_v10, %s914_s8  ;;  %s222_s15 = scalar_lea.vmem %s1189_s0, %s803_s12 }
  0x1a   : > { %v1025_v16 = vld [vmem:[%s222_s15] sm:$0xff]  ;;  %v1027_v17 = vld [vmem:[%s222_s15 + $0x8] sm:$0xff]  ;;  %v1029_v18 = vld [vmem:[%s222_s15 + $0x10] sm:$0x3f]  ;;  %798 = vmatpush3.bf16.msra.mxu0 %v795_v14  ;;  %v918_v14 = vmov 1983009808  }
  0x1b   : > { %v279_v19 = vmul.f32 %v277_v15, %v1027_v17  ;;  %v280_v20 = vmul.f32 %v277_v15, %v1029_v18  ;;  %v278_v21 = vmul.f32 %v277_v15, %v1025_v16  ;;  %v353_v29 = vmul.f32 %v351_v28, %v1027_v17 }
  0x1c   : > { %v354_v30 = vmul.f32 %v351_v28, %v1029_v18  ;;  %v352_v31 = vmul.f32 %v351_v28, %v1025_v16 }
  0x1d   : > { %373 = vrot.lane.b32.xlu0 %v371_v12, %s913_s7  ;;  %400 = vrot.lane.b32.xlu1 %v749_v13, %s914_s8  ;;  %v286_v22 = vrot.slane %v279_v19, 3  ;;  %v288_v23 = vrot.slane %v280_v20, 3  ;;  %v285_v24 = vrot.slane %v278_v21, 3  ;;  %v360_v42 = vrot.slane %v353_v29, 6  ;;  %s215_s7 = sand.u32 1, %s903_s19  }
  0x1e   : > { %v362_v43 = vrot.slane %v354_v30, 6  ;;  %v359_v44 = vrot.slane %v352_v31, 6  ;;  %s747_s8 = sshll.u32 %s215_s7, 2  ;;  %s671_s15 = scalar_lea.sflag [#allocation3], %s215_s7 }
  0x1f   : > { %v1035_v25 = vsel %vm284_vm0, %v286_v22, %v288_v23  ;;  %v1038_v26 = vsel %vm284_vm0, %v285_v24, %v286_v22  ;;  %v441_v22 = vld [vmem:[%s1192_s3 + $0x30] sm:$0xff]  ;;  %v442_v23 = vld [vmem:[%s1192_s3 + $0x38] sm:$0xff]  ;;  %s217_s10 = scalar_lea.vmem [#allocation2], %s747_s8 }
  0x20   : > { %v1059_v50 = vsel %vm358_vm1, %v360_v42, %v362_v43  ;;  %v1073_v58 = vsel %vm358_vm1, %v359_v44, %v360_v42  ;;  %v799_v24 = vpack.c.bf16 %v442_v23, %v441_v22  ;;  %s684_s11 = sshll.u32 %s217_s10, 4  ;;  %s1148_s11 = int_to_ptr.vmem [resolvable:$true] %s684_s11 }
  0x21   : > { %s849_s16 = scalar_lea.vmem %s1148_s11, 64 }
  0x22   : > { %800 = vmatprep.subr.bf16.mxu0 %v799_v24  ;;  %p850_p11 = scmp.ne.s32.totalorder %s1148_s11, %s849_s16 }
  0x23   : > { %802 = vmatpush3.bf16.msra.mxu0 %v799_v24 }
  0x24   : > { %p851_p12 = pnand %p850_p11, %p988_p5 }
  0x26   : > { %p852_p13 = pneg %p851_p12 }
  0x87   : > { %v240_v32 = vpop.permute.xlu0 %239  ;;  %v300_v33 = vpop.permute.xlu1 %299 }
  0x88   : > { %v242_v36 = vmul.f32 %v240_v32, %v1025_v16  ;;  %v243_v37 = vmul.f32 %v240_v32, %v1027_v17  ;;  %v302_v38 = vmul.f32 %v300_v33, %v1025_v16  ;;  %v303_v39 = vmul.f32 %v300_v33, %v1027_v17 }
  0x89   : > { %v304_v40 = vmul.f32 %v300_v33, %v1029_v18  ;;  %v230_v33 = vsub.s32 0, %v998_v1 }
  0x8a   : > { %248 = vrot.lane.b32.xlu1 %v243_v37, %s915_s26  ;;  %246 = vrot.lane.b32.xlu0 %v242_v36, %s915_s26  ;;  %v308_v46 = vrot.slane %v302_v38, 3  ;;  %v309_v47 = vrot.slane %v303_v39, 3 }
  0x8b   : > { %v260_v45 = vpop.permute.xlu0 %259  ;;  %v311_v48 = vrot.slane %v304_v40, 3  ;;  %v327_v49 = vpop.permute.xlu1 %326  ;;  %v231_v34 = vrot.slane %v1003_v2, %v230_v33 }
  0x8c   : > { %v262_v53 = vmul.f32 %v260_v45, %v1025_v16  ;;  %v263_v54 = vmul.f32 %v260_v45, %v1027_v17  ;;  %v329_v55 = vmul.f32 %v327_v49, %v1025_v16  ;;  %v330_v56 = vmul.f32 %v327_v49, %v1027_v17 }
  0x8d   : > { %v331_v57 = vmul.f32 %v327_v49, %v1029_v18  ;;  %v312_v63 = vsel %vm284_vm0, %v309_v47, %v311_v48  ;;  %v310_v0 = vsel %vm284_vm0, %v308_v46, %v309_v47  ;;  %v233_v35 = vmul.f32 %v231_v34, %v1027_v17 }
  0x8e   : > { %268 = vrot.lane.b32.xlu1 %v263_v54, %s916_s9  ;;  %266 = vrot.lane.b32.xlu0 %v262_v53, %s916_s9  ;;  %v335_v59 = vrot.slane %v329_v55, 3  ;;  %v336_v60 = vrot.slane %v330_v56, 3  ;;  %v232_v36 = vmul.f32 %v231_v34, %v1025_v16 }
  0x8f   : > { %v338_v62 = vrot.slane %v331_v57, 3  ;;  %v374_v3 = vpop.permute.xlu0 %373  ;;  %v401_v4 = vpop.permute.xlu1 %400 }
  0x90   : > { %v376_v7 = vmul.f32 %v374_v3, %v1025_v16  ;;  %v377_v8 = vmul.f32 %v374_v3, %v1027_v17  ;;  %v378_v9 = vmul.f32 %v374_v3, %v1029_v18  ;;  %v337_v11 = vsel %vm284_vm0, %v335_v59, %v336_v60 }
  0x91   : > { %v339_v10 = vsel %vm284_vm0, %v336_v60, %v338_v62  ;;  %v403_v12 = vmul.f32 %v401_v4, %v1025_v16  ;;  %v404_v13 = vmul.f32 %v401_v4, %v1027_v17  ;;  %v405_v21 = vmul.f32 %v401_v4, %v1029_v18 }
  0x92   : > { %315 = vrot.lane.b32.xlu1 %v312_v63, %s915_s26  ;;  %313 = vrot.lane.b32.xlu0 %v310_v0, %s915_s26  ;;  %v382_v15 = vrot.slane %v376_v7, 6  ;;  %v383_v19 = vrot.slane %v377_v8, 6  ;;  %v385_v20 = vrot.slane %v378_v9, 6 }
  0x93   : > { %v409_v27 = vrot.slane %v403_v12, 6  ;;  %v410_v28 = vrot.slane %v404_v13, 6  ;;  %v412_v29 = vrot.slane %v405_v21, 6 }
  0x94   : > { %v386_v18 = vsel %vm358_vm1, %v383_v19, %v385_v20  ;;  %v384_v30 = vsel %vm358_vm1, %v382_v15, %v383_v19  ;;  %v550_v15 = vunpack.c.l.s4 %v918_v14 }
  0x95   : > { %v413_v31 = vsel %vm358_vm1, %v410_v28, %v412_v29  ;;  %v411_v32 = vsel %vm358_vm1, %v409_v27, %v410_v28 }
  0x96   : > { %342 = vrot.lane.b32.xlu1 %v339_v10, %s916_s9  ;;  %340 = vrot.lane.b32.xlu0 %v337_v11, %s916_s9  ;;  %v551_v19 = vunpack.c.0.s8 %v550_v15 }
  0x98   : > { %v554_v20 = vsub.s32 %v551_v19, %v998_v1 }
  0x9a   : > { %389 = vrot.lane.b32.xlu1 %v386_v18, %s915_s26  ;;  %387 = vrot.lane.b32.xlu0 %v384_v30, %s915_s26 }
  0x9e   : > { %416 = vrot.lane.b32.xlu1 %v413_v31, %s916_s9  ;;  %414 = vrot.lane.b32.xlu0 %v411_v32, %s916_s9  ;;  %s755_s9 = sshll.u32 %s971_s22, 6  ;;  %s919_s22 = smov [#allocation2]  }
  0x9f   : > { %s1146_s14 = scalar_lea.hbm %s1194_s5, %s755_s9  ;;  %s853_s17 = sshll.u32 %s919_s22, 4  ;;  %s854_s17 = int_to_ptr.vmem [resolvable:$false] %s853_s17 }
  0xa0   : > { %s855_s23 = scalar_lea.vmem %s854_s17, 128  ;;  %p856_p0 = scmp.lt.s32.totalorder %s1148_s11, %s854_s17 }
  0xa1   : > { %p857_p1 = scmp.lt.s32.totalorder %s855_s23, %s849_s16 }
  0xa3   : > { %p858_p2 = por %p857_p1, %p856_p0 }
  0xa5   : > { %p859_p3 = pnand %p858_p2, %p852_p13 }
  0xfc   : > { %v249_v37 = vpop.permute.xlu1 %248  ;;  %v247_v38 = vpop.permute.xlu0 %246 }
  0xfd   : > { %v253_v39 = vadd.f32 %v249_v37, %v233_v35  ;;  %v252_v40 = vadd.f32 %v247_v38, %v232_v36 }
 0x100   : > { %v269_v41 = vpop.permute.xlu1 %268  ;;  %v267_v42 = vpop.permute.xlu0 %266 }
 0x101   : > { %v273_v43 = vadd.f32 %v269_v41, %v253_v39  ;;  %v272_v44 = vadd.f32 %v267_v42, %v252_v40 }
 0x103   : > { %v293_v45 = vadd.f32 %v1035_v25, %v273_v43  ;;  %v292_v46 = vadd.f32 %v1038_v26, %v272_v44  ;;  %v750_v25 = vld [vmem:[%s1191_s2] ss:$0 sm:$0xff] }
 0x104   : > { %v316_v47 = vpop.permute.xlu1 %315  ;;  %v314_v48 = vpop.permute.xlu0 %313 }
 0x105   : > { %v320_v49 = vadd.f32 %v316_v47, %v293_v45  ;;  %v319_v2 = vadd.f32 %v314_v48, %v292_v46 }
 0x108   : > { %v343_v51 = vpop.permute.xlu1 %342  ;;  %v341_v17 = vpop.permute.xlu0 %340 }
 0x109   : > { %v347_v52 = vadd.f32 %v343_v51, %v320_v49  ;;  %v346_v16 = vadd.f32 %v341_v17, %v319_v2 }
 0x10b   : > { %v367_v53 = vadd.f32 %v1059_v50, %v347_v52  ;;  %v366_v54 = vadd.f32 %v1073_v58, %v346_v16  ;;  %v751_v58 = vld [vmem:[%s1193_s4] ss:$0 sm:$0xff] }
 0x10c   : > { %v390_v55 = vpop.permute.xlu1 %389  ;;  %v388_v56 = vpop.permute.xlu0 %387 }
 0x10d   : > { %v394_v57 = vadd.f32 %v390_v55, %v367_v53  ;;  %v393_v59 = vadd.f32 %v388_v56, %v366_v54 }
 0x110   : > { %v417_v26 = vpop.permute.xlu1 %416  ;;  %v415_v60 = vpop.permute.xlu0 %414 }
 0x111   : > { %v421_v61 = vadd.f32 %v417_v26, %v394_v57  ;;  %v420_v62 = vadd.f32 %v415_v60, %v393_v59 }
 0x113   : > { %v430_v63 = vadd.f32 %v750_v25, %v421_v61  ;;  %v429_v0 = vadd.f32 %v750_v25, %v420_v62 }
 0x115   : > { %v432_v3 = vmax.f32 %v430_v63, 0.0  ;;  %v431_v4 = vmax.f32 %v429_v0, 0.0 }
 0x117   : > { %v434_v50 = vmin.f32 %v432_v3, 6.0  ;;  %v433_v5 = vmin.f32 %v431_v4, 6.0 }
 0x119   : > { %784 = vmatprep.mubr.msk.f32.mxu0 %vm450_vm2, %v433_v5 }
 0x11a   : > { %785 = vmatmul.mubr.msk.f32.vlgmr.msra.gmra.mrb[0].mxu0 %vm450_vm2, %v434_v50 }
 0x1ed   : > { %v786_v6 = vpop.f32.mrb[0].mxu0 }
 0x1ee   : > { %v529_v7 = vadd.f32 %v786_v6, %v751_v58  ;;  %v523_v8 = vpop.f32.mrb[1].mxu0 }
 0x1ef   : > { %v524_v9 = vadd.f32 %v751_v58, %v523_v8 }
 0x1f0   : > { %v533_v10 = vmax.f32 %v529_v7, 0.0 }
 0x1f1   : > { %v532_v11 = vmax.f32 %v524_v9, 0.0 }
 0x1f2   : > { %v535_v12 = vmin.f32 %v533_v10, 6.0 }
 0x1f3   : > { %v534_v13 = vmin.f32 %v532_v11, 6.0 }
 0x1f4   : > { %540 = vrot.lane.b32.xlu1 %v535_v12, %s917_s6 }
 0x1f5   : > { %538 = vrot.lane.b32.xlu0 %v534_v13, %s917_s6 }
 0x266   : > { %v541_v21 = vpop.permute.xlu1 %540 }
 0x267   : > { %v545_v22 = vmax.f32 %v535_v12, %v541_v21  ;;  %v539_v23 = vpop.permute.xlu0 %538 }
 0x268   : > { %v544_v24 = vmax.f32 %v534_v13, %v539_v23 }
 0x269   : > { %v565_v27 = vcombine.high %v545_v22, %v545_v22  ;;  %v572_v28 = vrot.slane %v545_v22, %v554_v20 }
 0x26a   : > { %v548_v29 = vcombine.high %v544_v24, %v544_v24  ;;  %v555_v18 = vrot.slane %v544_v24, %v554_v20 }
 0x26b   : > { %v579_v30 = vrot.slane %v565_v27, %v554_v20  ;;  %v580_v31 = vcombine.high %v572_v28, %v572_v28  ;;  %v619_v32 = vsel %vm590_vm3, %v572_v28, -inf }
 0x26c   : > { %v620_v33 = vrot.slane %v619_v32, 4  ;;  %v562_v34 = vrot.slane %v548_v29, %v554_v20  ;;  %v563_v35 = vcombine.high %v555_v18, %v555_v18  ;;  %v591_v36 = vsel %vm590_vm3, %v555_v18, -inf }
 0x26d   : > { %v581_v37 = vcombine.high %v579_v30, %v579_v30  ;;  %v626_v1 = vsel %vm590_vm3, %v580_v31, -inf  ;;  %v633_v38 = vsel %vm590_vm3, %v579_v30, -inf  ;;  %v592_v39 = vrot.slane %v591_v36, 4 }
 0x26e   : > { %v621_v40 = vmax.f32 %v619_v32, %v620_v33  ;;  %v627_v41 = vrot.slane %v626_v1, 4  ;;  %v634_v42 = vrot.slane %v633_v38, 4  ;;  %v564_v43 = vcombine.high %v562_v34, %v562_v34 }
 0x26f   : > { %v640_v44 = vsel %vm590_vm3, %v581_v37, -inf  ;;  %v593_v45 = vmax.f32 %v591_v36, %v592_v39  ;;  %v598_v46 = vsel %vm590_vm3, %v563_v35, -inf  ;;  %v605_v47 = vsel %vm590_vm3, %v562_v34, -inf }
 0x270   : > { %v622_v48 = vrot.slane %v621_v40, 2  ;;  %v628_v49 = vmax.f32 %v626_v1, %v627_v41  ;;  %v635_v2 = vmax.f32 %v633_v38, %v634_v42  ;;  %v641_v51 = vrot.slane %v640_v44, 4 }
 0x271   : > { %v594_v17 = vrot.slane %v593_v45, 2  ;;  %v599_v52 = vrot.slane %v598_v46, 4  ;;  %v606_v16 = vrot.slane %v605_v47, 4  ;;  %v612_v53 = vsel %vm590_vm3, %v564_v43, -inf }
 0x272   : > { %v629_v54 = vrot.slane %v628_v49, 2  ;;  %v636_v55 = vrot.slane %v635_v2, 2  ;;  %v642_v56 = vmax.f32 %v640_v44, %v641_v51  ;;  %v613_v26 = vrot.slane %v612_v53, 4 }
 0x273   : > { %v595_v57 = vmax.f32 %v593_v45, %v594_v17  ;;  %v600_v59 = vmax.f32 %v598_v46, %v599_v52  ;;  %v607_v25 = vmax.f32 %v605_v47, %v606_v16  ;;  %v623_v60 = vmax.f32 %v621_v40, %v622_v48 }
 0x274   : > { %v643_v61 = vrot.slane %v642_v56, 2  ;;  %v637_v62 = vmax.f32 %v635_v2, %v636_v55  ;;  %v614_v3 = vmax.f32 %v612_v53, %v613_v26  ;;  %v630_v4 = vmax.f32 %v628_v49, %v629_v54 }
 0x275   : > { %v601_v63 = vrot.slane %v600_v59, 2  ;;  %v608_v0 = vrot.slane %v607_v25, 2  ;;  %v596_v50 = vrot.slane %v595_v57, 1  ;;  %v624_v8 = vrot.slane %v623_v60, 1 }
 0x276   : > { %v615_v6 = vrot.slane %v614_v3, 2  ;;  %v644_v7 = vmax.f32 %v642_v56, %v643_v61  ;;  %v638_v12 = vrot.slane %v637_v62, 1  ;;  %v631_v13 = vrot.slane %v630_v4, 1 }
 0x277   : > { %v602_v5 = vmax.f32 %v600_v59, %v601_v63  ;;  %v609_v58 = vmax.f32 %v607_v25, %v608_v0  ;;  %v597_v14 = vmax.f32 %v595_v57, %v596_v50  ;;  %v625_v21 = vmax.f32 %v623_v60, %v624_v8 }
 0x278   : > { %v616_v11 = vmax.f32 %v614_v3, %v615_v6  ;;  %v645_v20 = vrot.slane %v644_v7, 1  ;;  %v639_v24 = vmax.f32 %v637_v62, %v638_v12  ;;  %v632_v28 = vmax.f32 %v630_v4, %v631_v13 }
 0x279   : > { %v603_v9 = vrot.slane %v602_v5, 1  ;;  %v610_v10 = vrot.slane %v609_v58, 1 }
 0x27a   : > { %v617_v19 = vrot.slane %v616_v11, 1  ;;  %v646_v18 = vmax.f32 %v644_v7, %v645_v20 }
 0x27b   : > { %v611_v15 = vmax.f32 %v609_v58, %v610_v10  ;;  %v604_v22 = vmax.f32 %v602_v5, %v603_v9 }
 0x27c   : > { %v618_v23 = vmax.f32 %v616_v11, %v617_v19 }
 0x27d   : > { %v652_v27 = vsel %vm651_vm4, %v611_v15, %v597_v14 }
 0x27e   : > { %v654_v29 = vsel %vm653_vm5, %v625_v21, %v652_v27  ;;  %v662_v30 = vsel %vm651_vm4, %v618_v23, %v604_v22 }
 0x27f   : > { %v656_v31 = vsel %vm655_vm6, %v639_v24, %v654_v29  ;;  %v663_v32 = vsel %vm653_vm5, %v632_v28, %v662_v30 }
 0x280   : > { %v664_v33 = vsel %vm655_vm6, %v646_v18, %v663_v32 }
 0x281   : > { %665 = vrot.lane.b32.xlu0 %v664_v33, %s917_s6 }
 0x2f3   : > { %v666_v34 = vpop.permute.xlu0 %665 }
 0x2f4   : > { %v668_v35 = vsel %vm450_vm2, %v656_v31, %v666_v34 }
 0x2f5   : > { %669 = vst [vmem:[%s217_s10] sm:$0xf] %v668_v35 }
 0x2f6   : > { %862 = shalt.err (!%p859_p3)
}
 0x2f7   : > { %s863_s25 = scalar_lea.hbm %s1146_s14, 64  ;;  %s867_s6 = scalar_lea.hbm %s1194_s5, 128 }
 0x2f8   : > { %p864_p4 = scmp.ne.s32.totalorder %s1146_s14, %s863_s25  ;;  %p868_p9 = scmp.lt.u32.totalorder %s1146_s14, %s1194_s5 }
 0x2f9   : > { %p869_p10 = scmp.lt.u32.totalorder %s867_s6, %s863_s25  ;;  %p871_p12 = scmp.lt.u32.totalorder %s863_s25, %s1146_s14 }
 0x2fa   : > { %p865_p7 = pnand %p864_p4, %p988_p5 }
 0x2fb   : > { %p870_p11 = por %p869_p10, %p868_p9 }
 0x2fc   : > { %p866_p8 = pneg %p865_p7 }
 0x2fd   : > { %p872_p13 = por %p871_p12, %p870_p11 }
 0x2ff   : > { %p873_p0 = pnand %p872_p13, %p866_p8 }
 0x301   : > { %876 = shalt.err (!%p873_p0)
}
 0x302   : > { %804 = dma.vmem_to_hbm [thread:$0]  (%p988_p5), %s1148_s11, 64, %s1146_s14, %s671_s15  }
 0x303 PF: > { %p810_p1 = scmp.ge.s32.totalorder %s911_s21, 2  ;;  %s696_s9 = sand.u32 1, %s899_s18  }
 0x304   : > { %s697_s10 = scalar_lea.sflag [#allocation3], %s696_s9 }
 0x305   : > { %p807_p2 = pnand %p810_p1, %p992_p6 }
 0x307   : > { %894 = dma.done.wait (!%p807_p2), %s697_s10, 64  }
 0x308   : > { %896 = vsyncadd (!%p807_p2), %s697_s10, 4294967232  ;;  %p15_p3 = scmp.ge.s32.totalorder %s975_s24, 4   ;;  %s1197_s18 = smov %s903_s19 }
 0x309   : > { %s1198_s19 = smov %s907_s20  ;;  %s1199_s20 = smov %s986_s27 }
 0x30a   : > { %s1200_s21 = smov %s975_s24  ;;  %17 = sbr.rel (!%p15_p3) target bundleno = 3 (0x3), region = 75 }
 0x311   :  { %702 = vsyncpa [#allocation3], 1 }
 0x312   :  { %704 = vsyncpa [#allocation3 + $0x1], 1 }

</bundles_post_ra>
